<compile_context>
chip_gen: v6e
topology: v6e:2x2x1
jax: 0.10.0
libtpu: 0.0.40
codegen_flags: <defaults>
</compile_context>

<pallas_src>
import functools

import jax
import jax.numpy as jnp
from jax import lax
from jax.experimental import pallas as pl
from jax.experimental.pallas import tpu as pltpu


_LANE = 128          # lane width (last-dim granule)
_SUBLANE_BF16 = 16   # bf16 sublane packing granule (second-to-last dim)


def _round_up(x: int, m: int) -> int:
    return ((x + m - 1) // m) * m


def _vmem_budget():
    """(capacity, tile budget, TILE_B cap) chosen per TPU generation."""
    try:
        cap = int(pltpu.get_tpu_info().vmem_capacity_bytes)
    except Exception:
        cap = 64 << 20                      # conservative: v7x per-TC VMEM
    if cap >= (100 << 20):                  # v5e / v6e: 128 MiB VMEM
        return cap, 64 << 20, 2048
    return cap, 40 << 20, 1024              # v7x: 64 MiB per-TC VMEM


# ---------------------------------------------------------------------------
# Kernels
# ---------------------------------------------------------------------------

def _linear_head_kernel(x_ref, w_ref, b_ref, o_ref):
    """Resident-weight path.

    x_ref: (TILE_B, D_in_p)  compute dtype (bf16 by default)
    w_ref: (D_in_p, D_out_p) compute dtype, canonical MXU orientation, resident
    b_ref: (1, D_out_p)      f32
    o_ref: (TILE_B, D_out_p) output dtype (f32)
    """
    y = jnp.dot(x_ref[...], w_ref[...], preferred_element_type=jnp.float32)
    y = y + b_ref[...]                                     # f32 epilogue
    # torch F.normalize(p=2, dim=1, eps=1e-12):
    #   denom = max(||y||_2, 1e-12) == rsqrt(max(sum(y*y), 1e-24)) (EUP).
    sumsq = jnp.sum(y * y, axis=-1, keepdims=True)
    inv_norm = lax.rsqrt(jnp.maximum(sumsq, jnp.float32(1e-24)))
    o_ref[...] = (y * inv_norm).astype(o_ref.dtype)


def _linear_head_kernel_ktiled(x_ref, w_ref, b_ref, o_ref, acc_ref):
    """K-tiled path: grid = (batch tiles, K tiles); f32 accumulator in VMEM."""
    k = pl.program_id(1)

    @pl.when(k == 0)
    def _():
        acc_ref[...] = jnp.zeros_like(acc_ref)

    acc_ref[...] += jnp.dot(x_ref[...], w_ref[...],
                            preferred_element_type=jnp.float32)

    @pl.when(k == pl.num_programs(1) - 1)
    def _():
        y = acc_ref[...] + b_ref[...]
        sumsq = jnp.sum(y * y, axis=-1, keepdims=True)
        inv_norm = lax.rsqrt(jnp.maximum(sumsq, jnp.float32(1e-24)))
        o_ref[...] = (y * inv_norm).astype(o_ref.dtype)


# ---------------------------------------------------------------------------
# pallas_call builders
# ---------------------------------------------------------------------------

def _resident_call(b_pad, d_in_p, d_out_p, tile_b, out_dtype, vmem_limit,
                   single_buffer_resident):
    grid = (pl.cdiv(b_pad, tile_b),)
    if single_buffer_resident:
        w_spec = pl.BlockSpec((d_in_p, d_out_p), lambda i: (0, 0),
                              pipeline_mode=pl.Buffered(1))
        bias_spec = pl.BlockSpec((1, d_out_p), lambda i: (0, 0),
                                 pipeline_mode=pl.Buffered(1))
    else:
        w_spec = pl.BlockSpec((d_in_p, d_out_p), lambda i: (0, 0))
        bias_spec = pl.BlockSpec((1, d_out_p), lambda i: (0, 0))
    return pl.pallas_call(
        _linear_head_kernel,
        out_shape=jax.ShapeDtypeStruct((b_pad, d_out_p), out_dtype),
        grid=grid,
        in_specs=[
            pl.BlockSpec((tile_b, d_in_p), lambda i: (i, 0)),   # x tile
            w_spec,                                             # weight, resident
            bias_spec,                                          # bias, resident
        ],
        out_specs=pl.BlockSpec((tile_b, d_out_p), lambda i: (i, 0)),
        compiler_params=pltpu.CompilerParams(
            dimension_semantics=("parallel",),
            vmem_limit_bytes=int(vmem_limit),
        ),
    )


def _ktiled_call(b_pad, d_in_p, d_out_p, tile_b, tile_k, out_dtype, vmem_limit,
                 single_buffer_resident):
    grid = (pl.cdiv(b_pad, tile_b), d_in_p // tile_k)
    if single_buffer_resident:
        bias_spec = pl.BlockSpec((1, d_out_p), lambda i, k: (0, 0),
                                 pipeline_mode=pl.Buffered(1))
    else:
        bias_spec = pl.BlockSpec((1, d_out_p), lambda i, k: (0, 0))
    return pl.pallas_call(
        _linear_head_kernel_ktiled,
        out_shape=jax.ShapeDtypeStruct((b_pad, d_out_p), out_dtype),
        grid=grid,
        in_specs=[
            pl.BlockSpec((tile_b, tile_k), lambda i, k: (i, k)),
            pl.BlockSpec((tile_k, d_out_p), lambda i, k: (k, 0)),
            bias_spec,
        ],
        out_specs=pl.BlockSpec((tile_b, d_out_p), lambda i, k: (i, 0)),
        scratch_shapes=[pltpu.VMEM((tile_b, d_out_p), jnp.float32)],
        compiler_params=pltpu.CompilerParams(
            dimension_semantics=("parallel", "arbitrary"),
            vmem_limit_bytes=int(vmem_limit),
        ),
    )


# ---------------------------------------------------------------------------
# Configuration selection
# ---------------------------------------------------------------------------

def _select_config(B, D_in, D_out, compute_bytes, out_bytes):
    cap, budget, tile_cap = _vmem_budget()
    d_in_p = _round_up(D_in, _LANE)
    d_out_p = _round_up(D_out, _LANE)
    b_pad = _round_up(B, _SUBLANE_BF16)

    w_bytes = d_in_p * d_out_p * compute_bytes   # single-buffered resident weight
    bias_bytes = d_out_p * 4
    headroom = 2 << 20

    if w_bytes <= budget // 2:
        # --- resident-weight path ---
        tile_budget = budget - w_bytes - bias_bytes - headroom
        per_row = 2 * d_in_p * compute_bytes + 2 * d_out_p * out_bytes  # dbl-buf x + out
        tile_b = (tile_budget // per_row) // _SUBLANE_BF16 * _SUBLANE_BF16
        tile_b = max(_SUBLANE_BF16, min(tile_b, tile_cap, b_pad))
        # Guarantee >=2 grid steps when the batch allows -> megacore on v7x.
        if pl.cdiv(b_pad, tile_b) == 1 and b_pad >= 2 * _SUBLANE_BF16:
            tile_b = _round_up(pl.cdiv(b_pad, 2), _SUBLANE_BF16)
        vmem_needed = (w_bytes + bias_bytes
                       + 2 * tile_b * d_in_p * compute_bytes
                       + 2 * tile_b * d_out_p * out_bytes
                       + headroom)
        # +w_bytes: stay valid even if the single-buffer hint is unsupported.
        vmem_limit = min(max(vmem_needed + w_bytes, 16 << 20), cap * 9 // 10)
        return dict(path="resident", d_in_p=d_in_p, d_out_p=d_out_p, b_pad=b_pad,
                    tile_b=tile_b, tile_k=None, vmem_limit=vmem_limit)

    # --- K-tiled fallback: resident weight would not fit the budget ---
    tile_b = min(tile_cap, max(_SUBLANE_BF16, min(b_pad, 256)))
    fixed = (2 * tile_b * d_out_p * out_bytes      # double-buffered out tiles
             + tile_b * d_out_p * 4                # f32 accumulator scratch
             + bias_bytes + headroom)
    per_k = 2 * tile_b * compute_bytes + 2 * d_out_p * compute_bytes
    avail = max(budget - fixed, 0)
    tile_k = max(_LANE, (avail // per_k) // _LANE * _LANE)
    tile_k = min(tile_k, _round_up(d_in_p, _LANE))
    d_in_p = _round_up(d_in_p, tile_k)             # K blocks must divide exactly
    vmem_needed = (fixed
                   + 2 * tile_b * tile_k * compute_bytes
                   + 2 * tile_k * d_out_p * compute_bytes)
    vmem_limit = min(max(vmem_needed, 16 << 20), cap * 9 // 10)
    return dict(path="ktiled", d_in_p=d_in_p, d_out_p=d_out_p, b_pad=b_pad,
                tile_b=tile_b, tile_k=tile_k, vmem_limit=vmem_limit)


# ---------------------------------------------------------------------------
# Public wrapper
# ---------------------------------------------------------------------------

def linear_head(x, weight, bias, *, compute_dtype=jnp.bfloat16, out_dtype=None):
    """LinearHead forward: L2-normalized rows of x @ weight.T + bias.

    x: (B, D_in) f32, weight: (D_out, D_in) f32 (PyTorch layout), bias: (D_out,).
    compute_dtype: MXU operand dtype (bf16 default; pass jnp.float32 for exact
    f32 Linear semantics). Epilogue math is always f32.
    """
    B, D_in = x.shape
    D_out, d_in_w = weight.shape
    assert d_in_w == D_in and bias.shape == (D_out,)
    out_dtype = out_dtype or x.dtype
    compute_bytes = jnp.dtype(compute_dtype).itemsize
    out_bytes = jnp.dtype(out_dtype).itemsize

    cfg = _select_config(B, D_in, D_out, compute_bytes, out_bytes)
    d_in_p, d_out_p, b_pad = cfg["d_in_p"], cfg["d_out_p"], cfg["b_pad"]

    # Pad (zeros -> no contribution to matmul or row norm) only when needed;
    # pad + dtype cast fuse into a single cheap XLA op.
    x_p = x
    if (b_pad, d_in_p) != (B, D_in):
        x_p = jnp.pad(x, ((0, b_pad - B), (0, d_in_p - D_in)))
    x_p = x_p.astype(compute_dtype)

    w_t = weight.T                      # one-time canonical (D_in, D_out) layout
    if (d_in_p, d_out_p) != (D_in, D_out):
        w_t = jnp.pad(w_t, ((0, d_in_p - D_in), (0, d_out_p - D_out)))
    w_t = w_t.astype(compute_dtype)

    bias_p = bias.astype(jnp.float32).reshape(1, D_out)
    if d_out_p != D_out:
        bias_p = jnp.pad(bias_p, ((0, 0), (0, d_out_p - D_out)))

    if cfg["path"] == "resident":
        builder = functools.partial(_resident_call, b_pad, d_in_p, d_out_p,
                                    cfg["tile_b"], out_dtype, cfg["vmem_limit"])
    else:
        builder = functools.partial(_ktiled_call, b_pad, d_in_p, d_out_p,
                                    cfg["tile_b"], cfg["tile_k"], out_dtype,
                                    cfg["vmem_limit"])

    try:
        out_padded = builder(True)(x_p, w_t, bias_p)
    except Exception:
        # Fallback for jax builds without BlockSpec pipeline_mode support.
        out_padded = builder(False)(x_p, w_t, bias_p)

    return out_padded[:B, :D_out]


# ---------------------------------------------------------------------------
# Self-test
# ---------------------------------------------------------------------------

if __name__ == "__main__":
    def reference(x, weight, bias, cast=None):
        if cast is not None:
            x = x.astype(cast).astype(jnp.float32)
            weight = weight.astype(cast).astype(jnp.float32)
        y = x @ weight.T + bias
        n = jnp.maximum(jnp.linalg.norm(y, axis=1, keepdims=True), 1e-12)
        return y / n

    def make_case(kx, kw, kb, B, D_in, D_out):
        # torch.nn.Linear default init: U(-1/sqrt(D_in), 1/sqrt(D_in)).
        bound = 1.0 / jnp.sqrt(jnp.float32(D_in))
        weight = jax.random.uniform(kw, (D_out, D_in), jnp.float32, -bound, bound)
        bias = jax.random.uniform(kb, (D_out,), jnp.float32, -bound, bound)
        x = jax.random.normal(kx, (B, D_in), jnp.float32)
        return x, weight, bias

    key = jax.random.PRNGKey(0)
    k1, k2, k3, k4, k5, k6 = jax.random.split(key, 6)

    cases = [
        ((8, 32, 16), (k1, k2, k3)),      # tiny BERT-pooled projection head
        ((40, 128, 96), (k4, k5, k6)),    # lane-aligned D_in, multi-tile batch
    ]
    for (B, D_in, D_out), (kx, kw, kb) in cases:
        x, weight, bias = make_case(kx, kw, kb, B, D_in, D_out)
        out = jax.block_until_ready(linear_head(x, weight, bias))
        assert out.shape == (B, D_out)
        # Tight check against a reference built from the same bf16-rounded
        # operands (MXU accumulates in f32, so this should match closely).
        ref_bf16 = reference(x, weight, bias, cast=jnp.bfloat16)
        assert jnp.allclose(out, ref_bf16, atol=1e-4, rtol=1e-4), (
            f"mismatch vs bf16-rounded reference for case {(B, D_in, D_out)}")
        # Loose check against the exact f32 torch semantics.
        ref_f32 = reference(x, weight, bias)
        assert jnp.allclose(out, ref_f32, atol=3e-2, rtol=3e-2), (
            f"mismatch vs f32 reference for case {(B, D_in, D_out)}")

    print("KERNEL_OK")
</pallas_src>

<mosaic_0001>
module attributes {stable_mosaic.version = 11 : i64} {
  func.func @_linear_head_kernel(%arg0: i32, %arg1: memref<16x128xbf16, #tpu.memory_space<vmem>>, %arg2: memref<128x128xbf16, #tpu.memory_space<vmem>>, %arg3: memref<1x128xf32, #tpu.memory_space<vmem>>, %arg4: memref<16x128xf32, #tpu.memory_space<vmem>>) attributes {dimension_semantics = [#tpu.dimension_semantics<parallel>], iteration_bounds = array<i64: 1>, scalar_prefetch = 0 : i64, scratch_operands = 0 : i64, tpu.core_type = #tpu.core_type<tc>, window_params = [{transform_indices = @transform_0, window_bounds = array<i64: 16, 128>}, {pipeline_mode = #tpu.pipeline_mode<synchronous>, transform_indices = @transform_1, window_bounds = array<i64: 128, 128>}, {pipeline_mode = #tpu.pipeline_mode<synchronous>, transform_indices = @transform_2, window_bounds = array<i64: 1, 128>}, {transform_indices = @transform_3, window_bounds = array<i64: 16, 128>}]} {
    %c0 = arith.constant 0 : index
    %c0_0 = arith.constant 0 : index
    %0 = vector.load %arg1[%c0, %c0_0] : memref<16x128xbf16, #tpu.memory_space<vmem>>, vector<16x128xbf16>
    %c0_1 = arith.constant 0 : index
    %c0_2 = arith.constant 0 : index
    %1 = vector.load %arg2[%c0_1, %c0_2] : memref<128x128xbf16, #tpu.memory_space<vmem>>, vector<128x128xbf16>
    %cst = arith.constant dense<0.000000e+00> : vector<16x128xf32>
    %2 = tpu.matmul %0, %1, %cst {dimension_numbers = #tpu.dot_dimension_numbers<[1], [0], [0], [1], [0, 0, 1, 1], [], []>} : vector<16x128xbf16>, vector<128x128xbf16>, vector<16x128xf32> -> vector<16x128xf32>
    %c0_3 = arith.constant 0 : index
    %c0_4 = arith.constant 0 : index
    %3 = vector.load %arg3[%c0_3, %c0_4] : memref<1x128xf32, #tpu.memory_space<vmem>>, vector<1x128xf32>
    %4 = vector.broadcast %3 : vector<1x128xf32> to vector<16x128xf32>
    %5 = arith.addf %2, %4 : vector<16x128xf32>
    %6 = arith.mulf %5, %5 : vector<16x128xf32>
    %cst_5 = arith.constant dense<0.000000e+00> : vector<16xf32>
    %7 = vector.multi_reduction <add>, %6, %cst_5 [1] : vector<16x128xf32> to vector<16xf32>
    %8 = vector.shape_cast %7 : vector<16xf32> to vector<16x1xf32>
    %cst_6 = arith.constant 1.000000e-24 : f32
    %9 = vector.broadcast %cst_6 : f32 to vector<16x1xf32>
    %10 = arith.maximumf %8, %9 : vector<16x1xf32>
    %11 = math.rsqrt %10 : vector<16x1xf32>
    %12 = vector.broadcast %11 : vector<16x1xf32> to vector<16x128xf32>
    %13 = arith.mulf %5, %12 : vector<16x128xf32>
    %c0_7 = arith.constant 0 : index
    %c0_8 = arith.constant 0 : index
    %14 = vector.load %arg4[%c0_7, %c0_8] : memref<16x128xf32, #tpu.memory_space<vmem>>, vector<16x128xf32>
    tpu.vector_store %arg4[%c0_7, %c0_8], %13 {strides = array<i32>} : memref<16x128xf32, #tpu.memory_space<vmem>>, vector<16x128xf32>,
    return
  }
  func.func @transform_0(%arg0: i32) -> (i32, i32) {
    %c0_i32 = arith.constant 0 : i32
    %c0_i32_0 = arith.constant 0 : i32
    return %arg0, %c0_i32 : i32, i32
  }
  func.func @transform_1(%arg0: i32) -> (i32, i32) {
    %c0_i32 = arith.constant 0 : i32
    %c0_i32_0 = arith.constant 0 : i32
    %c0_i32_1 = arith.constant 0 : i32
    return %c0_i32, %c0_i32_0 : i32, i32
  }
  func.func @transform_2(%arg0: i32) -> (i32, i32) {
    %c0_i32 = arith.constant 0 : i32
    %c0_i32_0 = arith.constant 0 : i32
    %c0_i32_1 = arith.constant 0 : i32
    return %c0_i32, %c0_i32_0 : i32, i32
  }
  func.func @transform_3(%arg0: i32) -> (i32, i32) {
    %c0_i32 = arith.constant 0 : i32
    %c0_i32_0 = arith.constant 0 : i32
    return %arg0, %c0_i32 : i32, i32
  }
}

module attributes {stable_mosaic.version = 11 : i64} {
  func.func @_linear_head_kernel(%arg0: i32, %arg1: memref<16x128xbf16, #tpu.memory_space<vmem>>, %arg2: memref<128x128xbf16, #tpu.memory_space<vmem>>, %arg3: memref<1x128xf32, #tpu.memory_space<vmem>>, %arg4: memref<16x128xf32, #tpu.memory_space<vmem>>) attributes {dimension_semantics = [#tpu.dimension_semantics<parallel>], iteration_bounds = array<i64: 1>, scalar_prefetch = 0 : i64, scratch_operands = 0 : i64, tpu.core_type = #tpu.core_type<tc>, window_params = [{transform_indices = @transform_0, window_bounds = array<i64: 16, 128>}, {pipeline_mode = #tpu.pipeline_mode<synchronous>, transform_indices = @transform_1, window_bounds = array<i64: 128, 128>}, {pipeline_mode = #tpu.pipeline_mode<synchronous>, transform_indices = @transform_2, window_bounds = array<i64: 1, 128>}, {transform_indices = @transform_3, window_bounds = array<i64: 16, 128>}]} {
    %c0 = arith.constant 0 : index
    %c0_0 = arith.constant 0 : index
    %0 = vector.load %arg1[%c0, %c0_0] : memref<16x128xbf16, #tpu.memory_space<vmem>>, vector<16x128xbf16>
    %c0_1 = arith.constant 0 : index
    %c0_2 = arith.constant 0 : index
    %1 = vector.load %arg2[%c0_1, %c0_2] : memref<128x128xbf16, #tpu.memory_space<vmem>>, vector<128x128xbf16>
    %cst = arith.constant dense<0.000000e+00> : vector<16x128xf32>
    %2 = tpu.matmul %0, %1, %cst {dimension_numbers = #tpu.dot_dimension_numbers<[1], [0], [0], [1], [0, 0, 1, 1], [], []>} : vector<16x128xbf16>, vector<128x128xbf16>, vector<16x128xf32> -> vector<16x128xf32>
    %c0_3 = arith.constant 0 : index
    %c0_4 = arith.constant 0 : index
    %3 = vector.load %arg3[%c0_3, %c0_4] : memref<1x128xf32, #tpu.memory_space<vmem>>, vector<1x128xf32>
    %4 = vector.broadcast %3 : vector<1x128xf32> to vector<16x128xf32>
    %5 = arith.addf %2, %4 : vector<16x128xf32>
    %6 = arith.mulf %5, %5 : vector<16x128xf32>
    %cst_5 = arith.constant dense<0.000000e+00> : vector<16xf32>
    %7 = vector.multi_reduction <add>, %6, %cst_5 [1] : vector<16x128xf32> to vector<16xf32>
    %8 = vector.shape_cast %7 : vector<16xf32> to vector<16x1xf32>
    %cst_6 = arith.constant 1.000000e-24 : f32
    %9 = vector.broadcast %cst_6 : f32 to vector<16x1xf32>
    %10 = arith.maximumf %8, %9 : vector<16x1xf32>
    %11 = math.rsqrt %10 : vector<16x1xf32>
    %12 = vector.broadcast %11 : vector<16x1xf32> to vector<16x128xf32>
    %13 = arith.mulf %5, %12 : vector<16x128xf32>
    %c0_7 = arith.constant 0 : index
    %c0_8 = arith.constant 0 : index
    %14 = vector.load %arg4[%c0_7, %c0_8] : memref<16x128xf32, #tpu.memory_space<vmem>>, vector<16x128xf32>
    tpu.vector_store %arg4[%c0_7, %c0_8], %13 {strides = array<i32>} : memref<16x128xf32, #tpu.memory_space<vmem>>, vector<16x128xf32>,
    return
  }
  func.func @transform_0(%arg0: i32) -> (i32, i32) {
    %c0_i32 = arith.constant 0 : i32
    %c0_i32_0 = arith.constant 0 : i32
    return %arg0, %c0_i32 : i32, i32
  }
  func.func @transform_1(%arg0: i32) -> (i32, i32) {
    %c0_i32 = arith.constant 0 : i32
    %c0_i32_0 = arith.constant 0 : i32
    %c0_i32_1 = arith.constant 0 : i32
    return %c0_i32, %c0_i32_0 : i32, i32
  }
  func.func @transform_2(%arg0: i32) -> (i32, i32) {
    %c0_i32 = arith.constant 0 : i32
    %c0_i32_0 = arith.constant 0 : i32
    %c0_i32_1 = arith.constant 0 : i32
    return %c0_i32, %c0_i32_0 : i32, i32
  }
  func.func @transform_3(%arg0: i32) -> (i32, i32) {
    %c0_i32 = arith.constant 0 : i32
    %c0_i32_0 = arith.constant 0 : i32
    return %arg0, %c0_i32 : i32, i32
  }
}

</mosaic_0001>

<bundles_post_ra>
// kernel: tpu_custom_call.1
= control target key start
LH: loop header
LB: loop body
LE: loop exit
PB: predicated region body
PF: predicated region fallthrough
CT: control target
= control target key end

     0   :  { %8 = vsyncpa [#allocation3], 0  ;;  %s364_s0 = inlined_call_operand.hbm [shape: bf16[16,128], index: 0, kind: input, shape index: {}]   ;;  %s365_s1 = inlined_call_operand.hbm [shape: bf16[128,128], index: 1, kind: input, shape index: {}]   ;;  %s366_s2 = inlined_call_operand.vmem [shape: f32[1,128], index: 2, kind: input, shape index: {}]   ;;  %s367_s3 = inlined_call_operand.hbm [shape: f32[16,128], index: 3, kind: output, shape index: {}]  }
   0x1   :  { %9 = vsyncpa [#allocation6], 0 }
   0x2   :  { %10 = vsyncpa [#allocation4], 0  ;;  %s323_s12 = smov [#allocation2]  }
   0x3   :  { %s16_s13 = sshll.u32 %s323_s12, 4  ;;  %s17_s13 = int_to_ptr.vmem [resolvable:$true] %s16_s13 }
   0x4   :  { %s265_s14 = scalar_lea.vmem %s17_s13, 128  ;;  %p270_p1 = scmp.lt.s32.totalorder %s17_s13, %s17_s13 }
   0x5   :  { %p266_p0 = scmp.ne.s32.totalorder %s17_s13, %s265_s14  ;;  %p271_p2 = scmp.lt.s32.totalorder %s265_s14, %s265_s14 }
   0x7   :  { %p272_p3 = por %p271_p2, %p270_p1 }
   0x9   :  { %p273_p4 = pnand %p272_p3, %p266_p0 }
   0xb   :  { %276 = shalt.err (!%p273_p4)
}
   0xc   :  { %s324_s15 = smov 64   ;;  %s325_s16 = smov 4  }
   0xd   :  { %22 = dma.hbm_to_vmem [thread:$0]  %s364_s0, 128, %s17_s13, [#allocation3], %s324_s15, %s324_s15, %s325_s16  }
   0xe   :  { %s326_s19 = smov [#allocation5]  }
   0xf   :  { %s28_s20 = sshll.u32 %s326_s19, 4  ;;  %s29_s20 = int_to_ptr.vmem [resolvable:$true] %s28_s20 }
  0x10   :  { %s285_s21 = scalar_lea.vmem %s29_s20, 1024  ;;  %p290_p6 = scmp.lt.s32.totalorder %s29_s20, %s29_s20 }
  0x11   :  { %p286_p5 = scmp.ne.s32.totalorder %s29_s20, %s285_s21  ;;  %p291_p7 = scmp.lt.s32.totalorder %s285_s21, %s285_s21 }
  0x13   :  { %p292_p8 = por %p291_p7, %p290_p6 }
  0x15   :  { %p293_p9 = pnand %p292_p8, %p286_p5 }
  0x17   :  { %296 = shalt.err (!%p293_p9)
}
  0x18   :  { %34 = dma.hbm_to_vmem [thread:$0]  %s365_s1, 1024, %s29_s20, [#allocation6], %s324_s15, %s324_s15, %s325_s16  }
  0x19   :  { %317 = dma.done.wait [#allocation3], 128  }
  0x1a   :  { %318 = vsyncadd [#allocation3], 4294967168 }
  0x1b   :  { %319 = dma.done.wait [#allocation6], 1024  }
  0x1c   :  { %320 = vsyncadd [#allocation6], 4294966272  ;;  %v327_v0 = vmov 0.0   ;;  %vm328_vm0 = vmmov 0   ;;  %v244_v1 = vld [vmem:[#allocation5 + $0x38] sm:$0xff]   ;;  %v245_v2 = vld [vmem:[#allocation5 + $0x30] sm:$0xff]  }
  0x1d   :  { %215 = vmatprep.subr.bf16.mxu0 %v327_v0  ;;  %231 = vmatprep.mubr.msk.bf16.mxu0 %vm328_vm0, %v327_v0  ;;  %v246_v3 = vld [vmem:[#allocation5 + $0x28] sm:$0xff]   ;;  %v247_v4 = vld [vmem:[#allocation5 + $0x20] sm:$0xff]   ;;  %v248_v5 = vld [vmem:[#allocation5 + $0x18] sm:$0xff]   ;;  %s329_s24 = smov [#allocation7]  }
  0x1e   :  { %216 = vmatpush3.bf16.msra.mxu0 %v244_v1  ;;  %v249_v6 = vld [vmem:[#allocation5 + $0x10] sm:$0xff]   ;;  %v250_v7 = vld [vmem:[#allocation5 + $0x8] sm:$0xff]   ;;  %v251_v8 = vld [vmem:[#allocation5] sm:$0xff]  }
  0x1f   :  { %217 = vmatprep.subr.bf16.mxu0 %v327_v0  ;;  %v252_v9 = vld [vmem:[#allocation2] sm:$0xff]  }
  0x20   :  { %v196_v10 = vld [vmem:[%s366_s2] ss:$0 sm:$0xff]  ;;  %s183_s2 = sshll.u32 %s329_s24, 4  ;;  %s184_s2 = int_to_ptr.vmem [resolvable:$true] %s183_s2 }
  0x21   :  { %s297_s25 = scalar_lea.vmem %s184_s2, 256  ;;  %p302_p11 = scmp.lt.s32.totalorder %s184_s2, %s184_s2 }
  0x22   :  { %218 = vmatpush3.bf16.msra.mxu0 %v245_v2  ;;  %p298_p10 = scmp.ne.s32.totalorder %s184_s2, %s297_s25  ;;  %p303_p12 = scmp.lt.s32.totalorder %s297_s25, %s297_s25 }
  0x23   :  { %219 = vmatprep.subr.bf16.mxu0 %v327_v0 }
  0x24   :  { %p304_p13 = por %p303_p12, %p302_p11 }
  0x26   :  { %220 = vmatpush3.bf16.msra.mxu0 %v246_v3  ;;  %p305_p0 = pnand %p304_p13, %p298_p10 }
  0x27   :  { %221 = vmatprep.subr.bf16.mxu0 %v327_v0 }
  0x2a   :  { %222 = vmatpush3.bf16.msra.mxu0 %v247_v4 }
  0x2b   :  { %223 = vmatprep.subr.bf16.mxu0 %v327_v0 }
  0x2e   :  { %224 = vmatpush3.bf16.msra.mxu0 %v248_v5 }
  0x2f   :  { %225 = vmatprep.subr.bf16.mxu0 %v327_v0 }
  0x32   :  { %226 = vmatpush3.bf16.msra.mxu0 %v249_v6 }
  0x33   :  { %227 = vmatprep.subr.bf16.mxu0 %v327_v0 }
  0x36   :  { %228 = vmatpush3.bf16.msra.mxu0 %v250_v7 }
  0x37   :  { %229 = vmatprep.subr.bf16.mxu0 %v327_v0 }
  0x3a   :  { %230 = vmatpush3.bf16.msra.mxu0 %v251_v8 }
  0x3d   :  { %232 = vmatmul.mubr.bf16.vlgmr.msra.gmra.mxu0 %v252_v9 }
  0xfd   :  { %v157_v11 = vpop.f32.mrf.mxu0 }
  0xfe   :  { %v158_v12 = vadd.f32 %v196_v10, %v157_v11 }
  0xff   :  { %v233_v13 = vpop.f32.mrf.mxu0 }
 0x100   :  { %v164_v14 = vmul.f32 %v158_v12, %v158_v12 }
 0x101   :  { %v160_v15 = vpop.f32.mrf.mxu0 }
 0x102   :  { %v161_v16 = vadd.f32 %v196_v10, %v160_v15  ;;  %166 = vadd.xlane.f32.xlu0 %v164_v14 }
 0x103   :  { %v234_v17 = vpop.f32.mrf.mxu0 }
 0x104   :  { %v165_v18 = vmul.f32 %v161_v16, %v161_v16 }
 0x106   :  { %168 = vadd.xlane.f32.xlu0 %v165_v18 }
 0x18b   :  { %v167_v19 = vpop.xlane.xlu0 %166 }
 0x18c   :  { %v170_v20 = vmax.f32 %v167_v19, 1e-24 }
 0x18e   :  { %253 = vrsqrt.f32 %v170_v20 }
 0x18f   :  { %v169_v21 = vpop.xlane.xlu0 %168 }
 0x190   :  { %v171_v22 = vmax.f32 %v169_v21, 1e-24 }
 0x192   :  { %255 = vrsqrt.f32 %v171_v22 }
 0x19b   :  { %v254_v23 = vpop.eup %253 }
 0x19c   :  { %v174_v24 = vmul.f32 %v254_v23, %v158_v12 }
 0x19e   :  { %176 = vst [vmem:[#allocation7] sm:$0xff] %v174_v24 }
 0x19f   :  { %v256_v25 = vpop.eup %255 }
 0x1a0   :  { %v175_v26 = vmul.f32 %v256_v25, %v161_v16 }
 0x1a2   :  { %177 = vst [vmem:[#allocation7 + $0x8] sm:$0xff] %v175_v26 }
 0x1a3   :  { %308 = shalt.err (!%p305_p0)
}
 0x1a4   :  { %s330_s26 = smov 128   ;;  %s331_s27 = smov 8  }
 0x1a5   :  { %189 = dma.vmem_to_hbm [thread:$0]  %s184_s2, 256, %s367_s3, [#allocation4], %s330_s26, %s330_s26, %s331_s27  }
 0x1a6   :  { %321 = dma.done.wait [#allocation4], 256  }
 0x1a7   :  { %322 = vsyncadd [#allocation4], 4294967040 }
 0x1a8   :  { %193 = vsyncpa [#allocation3], 1 }
 0x1a9   :  { %194 = vsyncpa [#allocation6], 1 }
 0x1aa   :  { %195 = vsyncpa [#allocation4], 1 }

// kernel: tpu_custom_call.1
= control target key start
LH: loop header
LB: loop body
LE: loop exit
PB: predicated region body
PF: predicated region fallthrough
CT: control target
= control target key end

     0   :  { %8 = vsyncpa [#allocation3], 0  ;;  %s364_s0 = inlined_call_operand.hbm [shape: bf16[16,128], index: 0, kind: input, shape index: {}]   ;;  %s365_s1 = inlined_call_operand.hbm [shape: bf16[128,128], index: 1, kind: input, shape index: {}]   ;;  %s366_s2 = inlined_call_operand.vmem [shape: f32[1,128], index: 2, kind: input, shape index: {}]   ;;  %s367_s3 = inlined_call_operand.hbm [shape: f32[16,128], index: 3, kind: output, shape index: {}]  }
   0x1   :  { %9 = vsyncpa [#allocation6], 0 }
   0x2   :  { %10 = vsyncpa [#allocation4], 0  ;;  %s323_s12 = smov [#allocation2]  }
   0x3   :  { %s16_s13 = sshll.u32 %s323_s12, 4  ;;  %s17_s13 = int_to_ptr.vmem [resolvable:$true] %s16_s13 }
   0x4   :  { %s265_s14 = scalar_lea.vmem %s17_s13, 128  ;;  %p270_p1 = scmp.lt.s32.totalorder %s17_s13, %s17_s13 }
   0x5   :  { %p266_p0 = scmp.ne.s32.totalorder %s17_s13, %s265_s14  ;;  %p271_p2 = scmp.lt.s32.totalorder %s265_s14, %s265_s14 }
   0x7   :  { %p272_p3 = por %p271_p2, %p270_p1 }
   0x9   :  { %p273_p4 = pnand %p272_p3, %p266_p0 }
   0xb   :  { %276 = shalt.err (!%p273_p4)
}
   0xc   :  { %s324_s15 = smov 64   ;;  %s325_s16 = smov 4  }
   0xd   :  { %22 = dma.hbm_to_vmem [thread:$0]  %s364_s0, 128, %s17_s13, [#allocation3], %s324_s15, %s324_s15, %s325_s16  }
   0xe   :  { %s326_s19 = smov [#allocation5]  }
   0xf   :  { %s28_s20 = sshll.u32 %s326_s19, 4  ;;  %s29_s20 = int_to_ptr.vmem [resolvable:$true] %s28_s20 }
  0x10   :  { %s285_s21 = scalar_lea.vmem %s29_s20, 1024  ;;  %p290_p6 = scmp.lt.s32.totalorder %s29_s20, %s29_s20 }
  0x11   :  { %p286_p5 = scmp.ne.s32.totalorder %s29_s20, %s285_s21  ;;  %p291_p7 = scmp.lt.s32.totalorder %s285_s21, %s285_s21 }
  0x13   :  { %p292_p8 = por %p291_p7, %p290_p6 }
  0x15   :  { %p293_p9 = pnand %p292_p8, %p286_p5 }
  0x17   :  { %296 = shalt.err (!%p293_p9)
}
  0x18   :  { %34 = dma.hbm_to_vmem [thread:$0]  %s365_s1, 1024, %s29_s20, [#allocation6], %s324_s15, %s324_s15, %s325_s16  }
  0x19   :  { %317 = dma.done.wait [#allocation3], 128  }
  0x1a   :  { %318 = vsyncadd [#allocation3], 4294967168 }
  0x1b   :  { %319 = dma.done.wait [#allocation6], 1024  }
  0x1c   :  { %320 = vsyncadd [#allocation6], 4294966272  ;;  %v327_v0 = vmov 0.0   ;;  %vm328_vm0 = vmmov 0   ;;  %v244_v1 = vld [vmem:[#allocation5 + $0x38] sm:$0xff]   ;;  %v245_v2 = vld [vmem:[#allocation5 + $0x30] sm:$0xff]  }
  0x1d   :  { %215 = vmatprep.subr.bf16.mxu0 %v327_v0  ;;  %231 = vmatprep.mubr.msk.bf16.mxu0 %vm328_vm0, %v327_v0  ;;  %v246_v3 = vld [vmem:[#allocation5 + $0x28] sm:$0xff]   ;;  %v247_v4 = vld [vmem:[#allocation5 + $0x20] sm:$0xff]   ;;  %v248_v5 = vld [vmem:[#allocation5 + $0x18] sm:$0xff]   ;;  %s329_s24 = smov [#allocation7]  }
  0x1e   :  { %216 = vmatpush3.bf16.msra.mxu0 %v244_v1  ;;  %v249_v6 = vld [vmem:[#allocation5 + $0x10] sm:$0xff]   ;;  %v250_v7 = vld [vmem:[#allocation5 + $0x8] sm:$0xff]   ;;  %v251_v8 = vld [vmem:[#allocation5] sm:$0xff]  }
  0x1f   :  { %217 = vmatprep.subr.bf16.mxu0 %v327_v0  ;;  %v252_v9 = vld [vmem:[#allocation2] sm:$0xff]  }
  0x20   :  { %v196_v10 = vld [vmem:[%s366_s2] ss:$0 sm:$0xff]  ;;  %s183_s2 = sshll.u32 %s329_s24, 4  ;;  %s184_s2 = int_to_ptr.vmem [resolvable:$true] %s183_s2 }
  0x21   :  { %s297_s25 = scalar_lea.vmem %s184_s2, 256  ;;  %p302_p11 = scmp.lt.s32.totalorder %s184_s2, %s184_s2 }
  0x22   :  { %218 = vmatpush3.bf16.msra.mxu0 %v245_v2  ;;  %p298_p10 = scmp.ne.s32.totalorder %s184_s2, %s297_s25  ;;  %p303_p12 = scmp.lt.s32.totalorder %s297_s25, %s297_s25 }
  0x23   :  { %219 = vmatprep.subr.bf16.mxu0 %v327_v0 }
  0x24   :  { %p304_p13 = por %p303_p12, %p302_p11 }
  0x26   :  { %220 = vmatpush3.bf16.msra.mxu0 %v246_v3  ;;  %p305_p0 = pnand %p304_p13, %p298_p10 }
  0x27   :  { %221 = vmatprep.subr.bf16.mxu0 %v327_v0 }
  0x2a   :  { %222 = vmatpush3.bf16.msra.mxu0 %v247_v4 }
  0x2b   :  { %223 = vmatprep.subr.bf16.mxu0 %v327_v0 }
  0x2e   :  { %224 = vmatpush3.bf16.msra.mxu0 %v248_v5 }
  0x2f   :  { %225 = vmatprep.subr.bf16.mxu0 %v327_v0 }
  0x32   :  { %226 = vmatpush3.bf16.msra.mxu0 %v249_v6 }
  0x33   :  { %227 = vmatprep.subr.bf16.mxu0 %v327_v0 }
  0x36   :  { %228 = vmatpush3.bf16.msra.mxu0 %v250_v7 }
  0x37   :  { %229 = vmatprep.subr.bf16.mxu0 %v327_v0 }
  0x3a   :  { %230 = vmatpush3.bf16.msra.mxu0 %v251_v8 }
  0x3d   :  { %232 = vmatmul.mubr.bf16.vlgmr.msra.gmra.mxu0 %v252_v9 }
  0xfd   :  { %v157_v11 = vpop.f32.mrf.mxu0 }
  0xfe   :  { %v158_v12 = vadd.f32 %v196_v10, %v157_v11 }
  0xff   :  { %v233_v13 = vpop.f32.mrf.mxu0 }
 0x100   :  { %v164_v14 = vmul.f32 %v158_v12, %v158_v12 }
 0x101   :  { %v160_v15 = vpop.f32.mrf.mxu0 }
 0x102   :  { %v161_v16 = vadd.f32 %v196_v10, %v160_v15  ;;  %166 = vadd.xlane.f32.xlu0 %v164_v14 }
 0x103   :  { %v234_v17 = vpop.f32.mrf.mxu0 }
 0x104   :  { %v165_v18 = vmul.f32 %v161_v16, %v161_v16 }
 0x106   :  { %168 = vadd.xlane.f32.xlu0 %v165_v18 }
 0x18b   :  { %v167_v19 = vpop.xlane.xlu0 %166 }
 0x18c   :  { %v170_v20 = vmax.f32 %v167_v19, 1e-24 }
 0x18e   :  { %253 = vrsqrt.f32 %v170_v20 }
 0x18f   :  { %v169_v21 = vpop.xlane.xlu0 %168 }
 0x190   :  { %v171_v22 = vmax.f32 %v169_v21, 1e-24 }
 0x192   :  { %255 = vrsqrt.f32 %v171_v22 }
 0x19b   :  { %v254_v23 = vpop.eup %253 }
 0x19c   :  { %v174_v24 = vmul.f32 %v254_v23, %v158_v12 }
 0x19e   :  { %176 = vst [vmem:[#allocation7] sm:$0xff] %v174_v24 }
 0x19f   :  { %v256_v25 = vpop.eup %255 }
 0x1a0   :  { %v175_v26 = vmul.f32 %v256_v25, %v161_v16 }
 0x1a2   :  { %177 = vst [vmem:[#allocation7 + $0x8] sm:$0xff] %v175_v26 }
 0x1a3   :  { %308 = shalt.err (!%p305_p0)
}
 0x1a4   :  { %s330_s26 = smov 128   ;;  %s331_s27 = smov 8  }
 0x1a5   :  { %189 = dma.vmem_to_hbm [thread:$0]  %s184_s2, 256, %s367_s3, [#allocation4], %s330_s26, %s330_s26, %s331_s27  }
 0x1a6   :  { %321 = dma.done.wait [#allocation4], 256  }
 0x1a7   :  { %322 = vsyncadd [#allocation4], 4294967040 }
 0x1a8   :  { %193 = vsyncpa [#allocation3], 1 }
 0x1a9   :  { %194 = vsyncpa [#allocation6], 1 }
 0x1aa   :  { %195 = vsyncpa [#allocation4], 1 }

</bundles_post_ra>
